<compile_context>
chip_gen: v7x
topology: tpu7x:2x2x1
jax: 0.10.0
libtpu: 0.0.40
codegen_flags: <defaults>
</compile_context>

<pallas_src>
import functools

import numpy as np
import jax
import jax.numpy as jnp
from jax.experimental import pallas as pl
from jax.experimental.pallas import tpu as pltpu


LANES = 512            # last-dim width of the flattened slab (multiple of 128)
ROWS_PER_TILE = 1024   # sublane rows per grid step (multiple of 8)


def _scale_kernel(x_ref, o_ref, *, scale):
    # Whole-tile element-wise multiply; VPU-only, memory bound.
    o_ref[...] = x_ref[...] * scale


def _round_up(x, m):
    return ((x + m - 1) // m) * m


def uniform_box_warp(coordinates, sidelength, *,
                     lanes=LANES, rows_per_tile=ROWS_PER_TILE):
    """Pallas TPU implementation of `coordinates * (2 / sidelength)`.

    Works for any input shape / float dtype; returns the same shape / dtype.
    """
    scale = 2.0 / float(sidelength)
    orig_shape = coordinates.shape
    total = int(np.prod(orig_shape)) if len(orig_shape) else 1

    flat = coordinates.reshape(-1)

    # Lane-dense 2-D layout, padded so every grid step is a full (tr, lanes)
    # block (keeps the (8, 128) tiling constraint satisfied with no edge
    # blocks / masked partial stores).
    rows = pl.cdiv(total, lanes)
    tr = min(rows_per_tile, _round_up(rows, 8))
    rows_padded = _round_up(rows, tr)
    padded_total = rows_padded * lanes
    if padded_total != total:
        flat = jnp.pad(flat, (0, padded_total - total))
    x2d = flat.reshape(rows_padded, lanes)

    out2d = pl.pallas_call(
        functools.partial(_scale_kernel, scale=scale),
        out_shape=jax.ShapeDtypeStruct((rows_padded, lanes), coordinates.dtype),
        grid=(rows_padded // tr,),
        in_specs=[pl.BlockSpec((tr, lanes), lambda i: (i, 0))],
        out_specs=pl.BlockSpec((tr, lanes), lambda i: (i, 0)),
        compiler_params=pltpu.CompilerParams(
            dimension_semantics=("parallel",)),
    )(x2d)

    return out2d.reshape(-1)[:total].reshape(orig_shape)


if __name__ == "__main__":
    key = jax.random.PRNGKey(0)

    # Small shapes consistent with the module: a batch of xyz point coordinates.
    B, N, C = 2, 1024, 3
    sidelength = 0.24            # scale_factor = 2 / 0.24
    coords = jax.random.normal(key, (B, N, C), jnp.float32)

    out = jax.block_until_ready(uniform_box_warp(coords, sidelength))
    assert out.shape == coords.shape and out.dtype == coords.dtype

    expected = np.asarray(coords) * (2.0 / sidelength)
    np.testing.assert_allclose(np.asarray(out), expected, rtol=1e-5, atol=1e-6)
    print("KERNEL_OK")
</pallas_src>

<mosaic_0001>
module attributes {stable_mosaic.version = 11 : i64} {
  func.func @_scale_kernel(%arg0: i32, %arg1: memref<16x512xf32, #tpu.memory_space<vmem>>, %arg2: memref<16x512xf32, #tpu.memory_space<vmem>>) attributes {dimension_semantics = [#tpu.dimension_semantics<parallel>], iteration_bounds = array<i64: 1>, scalar_prefetch = 0 : i64, scratch_operands = 0 : i64, tpu.core_type = #tpu.core_type<tc>, window_params = [{transform_indices = @transform_0, window_bounds = array<i64: 16, 512>}, {transform_indices = @transform_1, window_bounds = array<i64: 16, 512>}]} {
    %c0 = arith.constant 0 : index
    %c0_0 = arith.constant 0 : index
    %0 = vector.load %arg1[%c0, %c0_0] : memref<16x512xf32, #tpu.memory_space<vmem>>, vector<16x512xf32>
    %cst = arith.constant 8.33333301 : f32
    %1 = vector.broadcast %cst : f32 to vector<16x512xf32>
    %2 = arith.mulf %0, %1 : vector<16x512xf32>
    %c0_1 = arith.constant 0 : index
    %c0_2 = arith.constant 0 : index
    %3 = vector.load %arg2[%c0_1, %c0_2] : memref<16x512xf32, #tpu.memory_space<vmem>>, vector<16x512xf32>
    tpu.vector_store %arg2[%c0_1, %c0_2], %2 {strides = array<i32>} : memref<16x512xf32, #tpu.memory_space<vmem>>, vector<16x512xf32>,
    return
  }
  func.func @transform_0(%arg0: i32) -> (i32, i32) {
    %c0_i32 = arith.constant 0 : i32
    %c0_i32_0 = arith.constant 0 : i32
    return %arg0, %c0_i32 : i32, i32
  }
  func.func @transform_1(%arg0: i32) -> (i32, i32) {
    %c0_i32 = arith.constant 0 : i32
    %c0_i32_0 = arith.constant 0 : i32
    return %arg0, %c0_i32 : i32, i32
  }
}

</mosaic_0001>

<bundles_post_ra>
// kernel: tpu_custom_call.1
= control target key start
LH: loop header
LB: loop body
LE: loop exit
PB: predicated region body
PF: predicated region fallthrough
CT: control target
= control target key end

     0   :  { %6 = vsyncpa [#allocation3], 0  ;;  %s160_s0 = inlined_call_operand.hbm [shape: f32[16,512], index: 0, kind: input, shape index: {}]   ;;  %s161_s1 = inlined_call_operand.hbm [shape: f32[16,512], index: 1, kind: output, shape index: {}]  }
   0x1   :  { %7 = vsyncpa [#allocation4], 0  ;;  %s116_s6 = smov [#allocation2]   ;;  %s68_s10 = scalar_lea.hbm %s160_s0, 1024 }
   0x2   :  { %s13_s7 = sshll.u32 %s116_s6, 4  ;;  %p69_p0 = scmp.ne.s32.totalorder %s160_s0, %s68_s10  ;;  %s14_s7 = int_to_ptr.vmem [resolvable:$true] %s13_s7 }
   0x3   :  { %p72_p1 = scmp.lt.u32.totalorder %s68_s10, %s160_s0 }
   0x5   :  { %p74_p2 = pnand %p72_p1, %p69_p0 }
   0x7   :  { %77 = shalt.err (!%p74_p2)
}
   0x8   :  { %s78_s15 = scalar_lea.vmem %s14_s7, 1024  ;;  %p83_p4 = scmp.lt.s32.totalorder %s14_s7, %s14_s7 }
   0x9   :  { %p79_p3 = scmp.ne.s32.totalorder %s14_s7, %s78_s15  ;;  %p84_p5 = scmp.lt.s32.totalorder %s78_s15, %s78_s15 }
   0xb   :  { %p85_p6 = por %p84_p5, %p83_p4 }
   0xd   :  { %p86_p7 = pnand %p85_p6, %p79_p3 }
   0xf   :  { %89 = shalt.err (!%p86_p7)
}
  0x10   :  { %s117_s16 = smov 512   ;;  %s118_s17 = smov 32  }
  0x11   :  { %19 = dma.hbm_to_vmem [thread:$0]  %s160_s0, 1024, %s14_s7, [#allocation3], %s117_s16, %s117_s16, %s118_s17  }
  0x12   :  { %112 = dma.done.wait [#allocation3], 1024  }
  0x13   :  { %113 = vsyncadd [#allocation3], 4294966272  ;;  %v23_v0 = vld [vmem:[#allocation2] sm:$0xff]  ;;  %v24_v1 = vld [vmem:[#allocation2 + $0x8] sm:$0xff]  ;;  %s119_s20 = smov [#allocation5]  }
  0x14   :  { %v25_v2 = vld [vmem:[#allocation2 + $0x10] sm:$0xff]  ;;  %v31_v3 = vmul.f32 8.333333, %v23_v0  ;;  %v32_v4 = vmul.f32 8.333333, %v24_v1  ;;  %v26_v6 = vld [vmem:[#allocation2 + $0x18] sm:$0xff] }
  0x15   :  { %v33_v5 = vmul.f32 8.333333, %v25_v2  ;;  %v27_v7 = vld [vmem:[#allocation2 + $0x20] sm:$0xff]  ;;  %v28_v8 = vld [vmem:[#allocation2 + $0x28] sm:$0xff]  ;;  %s52_s21 = sshll.u32 %s119_s20, 4  ;;  %v29_v12 = vld [vmem:[#allocation2 + $0x30] sm:$0xff]  ;;  %s53_s21 = int_to_ptr.vmem [resolvable:$true] %s52_s21 }
  0x16   :  { %39 = vst [vmem:[#allocation5] sm:$0xff] %v31_v3  ;;  %40 = vst [vmem:[#allocation5 + $0x8] sm:$0xff] %v32_v4  ;;  %v34_v9 = vmul.f32 8.333333, %v26_v6  ;;  %v35_v10 = vmul.f32 8.333333, %v27_v7  ;;  %p95_p9 = scmp.lt.s32.totalorder %s53_s21, %s53_s21 }
  0x17   :  { %41 = vst [vmem:[#allocation5 + $0x10] sm:$0xff] %v33_v5  ;;  %v36_v11 = vmul.f32 8.333333, %v28_v8  ;;  %v30_v13 = vld [vmem:[#allocation2 + $0x38] sm:$0xff]  ;;  %v37_v14 = vmul.f32 8.333333, %v29_v12 }
  0x18   :  { %42 = vst [vmem:[#allocation5 + $0x18] sm:$0xff] %v34_v9  ;;  %43 = vst [vmem:[#allocation5 + $0x20] sm:$0xff] %v35_v10  ;;  %v38_v15 = vmul.f32 8.333333, %v30_v13  ;;  %s90_s0 = scalar_lea.vmem %s53_s21, 1024 }
  0x19   :  { %44 = vst [vmem:[#allocation5 + $0x28] sm:$0xff] %v36_v11  ;;  %45 = vst [vmem:[#allocation5 + $0x30] sm:$0xff] %v37_v14  ;;  %p91_p8 = scmp.ne.s32.totalorder %s53_s21, %s90_s0  ;;  %p96_p10 = scmp.lt.s32.totalorder %s90_s0, %s90_s0 }
  0x1a   :  { %46 = vst [vmem:[#allocation5 + $0x38] sm:$0xff] %v38_v15 }
  0x1b   :  { %p97_p11 = por %p96_p10, %p95_p9 }
  0x1d   :  { %p98_p12 = pnand %p97_p11, %p91_p8 }
  0x1f   :  { %101 = shalt.err (!%p98_p12)
}
  0x20   :  { %s102_s24 = scalar_lea.hbm %s161_s1, 1024 }
  0x21   :  { %p103_p13 = scmp.ne.s32.totalorder %s161_s1, %s102_s24  ;;  %p106_p0 = scmp.lt.u32.totalorder %s102_s24, %s161_s1 }
  0x23   :  { %p108_p1 = pnand %p106_p0, %p103_p13 }
  0x25   :  { %111 = shalt.err (!%p108_p1)
}
  0x26   :  { %58 = dma.vmem_to_hbm [thread:$0]  %s53_s21, 1024, %s161_s1, [#allocation4], %s117_s16, %s117_s16, %s118_s17  }
  0x27   :  { %114 = dma.done.wait [#allocation4], 1024  }
  0x28   :  { %115 = vsyncadd [#allocation4], 4294966272 }
  0x29   :  { %62 = vsyncpa [#allocation3], 1 }
  0x2a   :  { %63 = vsyncpa [#allocation4], 1 }

</bundles_post_ra>
